<compile_context>
chip_gen: v5e
topology: v5e:2x2
jax: 0.10.0
libtpu: 0.0.40
codegen_flags: <defaults>
</compile_context>

<pallas_src>
import jax
import jax.numpy as jnp
from jax import lax
from jax.experimental import pallas as pl
from jax.experimental.pallas import tpu as pltpu

HIDDEN = 128      # fixed by nn.RNN(embedding_dim, 128)
C_PAD = 128       # lane-dense padded class dimension
NEG_BIG = -1e30   # drives padded logits to ~0 probability after softmax


def rnn_classifier_kernel(ids_ref, xtab_ref, whh_ref, wout_ref, bout_ref,
                          out_ref, xproj_ref):
    # ids_ref:   (T*Bp, 1) int32   time-major flattened token ids (batch padded to Bp)
    # xtab_ref:  (V, H)    bf16    folded table: emb @ W_ih + (b_ih + b_hh)
    # whh_ref:   (H, H)    bf16    hidden->hidden weight (pre-transposed, (in, out))
    # wout_ref:  (H, Cp)   bf16    classifier weight, zero-padded to Cp=128 columns
    # bout_ref:  (1, Cp)   f32     classifier bias, padded lanes = -1e30
    # out_ref:   (Bp, Cp)  f32     softmax probabilities (valid block = [:B, :C])
    # xproj_ref: (T*Bp, H) f32     scratch: hoisted per-step RNN input term
    TB = ids_ref.shape[0]
    V = xtab_ref.shape[0]
    H = whh_ref.shape[0]
    Bp = out_ref.shape[0]
    T = TB // Bp

    # ---- fused gather + input projection + bias: a single one-hot matmul ----
    # one-hot values are exact in bf16; f32 accumulation -> exact row pick of xtab.
    ids = ids_ref[...]                                          # (TB, 1) int32
    iota_v = lax.broadcasted_iota(jnp.int32, (TB, V), 1)        # (TB, V)
    onehot = jnp.where(iota_v == ids, 1.0, 0.0).astype(jnp.bfloat16)
    xproj_ref[...] = jnp.dot(onehot, xtab_ref[...],
                             preferred_element_type=jnp.float32)  # (TB, H) f32

    whh = whh_ref[...]                                          # (H, H) bf16

    def step(t, h):
        start = pl.multiple_of(t * Bp, Bp)
        x_t = xproj_ref[pl.ds(start, Bp), :]                    # contiguous (Bp, H)
        pre = x_t + jnp.dot(h.astype(jnp.bfloat16), whh,
                            preferred_element_type=jnp.float32)
        return jnp.tanh(pre)                                    # f32 on VPU/EUP

    h0 = jnp.zeros((Bp, H), jnp.float32)
    h = lax.fori_loop(0, T, step, h0, unroll=True)

    # ---- classifier head + softmax (lane-dense Cp=128 output) ----
    logits = (jnp.dot(h.astype(jnp.bfloat16), wout_ref[...],
                      preferred_element_type=jnp.float32)
              + bout_ref[...])                                  # (Bp, Cp)
    m = jnp.max(logits, axis=1, keepdims=True)
    e = jnp.exp(logits - m)
    denom = jnp.sum(e, axis=1, keepdims=True)
    out_ref[...] = e * pl.reciprocal(denom, approx=True)


def torch_model_forward(x_ids, params):
    """x_ids: (B, T) int32 token ids. Returns softmax probs (B, sentence_length)."""
    B, T = x_ids.shape
    H = params["w_hh"].shape[0]
    Cp = params["w_out"].shape[1]              # padded class dim (128)
    C = params["num_classes"]

    Bp = ((B + 7) // 8) * 8                    # pad batch to full sublanes

    # pad batch with token 0 (padding row -> bias-only input), go time-major, flatten
    x_pad = jnp.zeros((Bp, T), jnp.int32).at[:B, :].set(x_ids)
    ids_tm = jnp.transpose(x_pad, (1, 0)).reshape(T * Bp, 1)

    vmem = pl.BlockSpec(memory_space=pltpu.MemorySpace.VMEM)
    out = pl.pallas_call(
        rnn_classifier_kernel,
        out_shape=jax.ShapeDtypeStruct((Bp, Cp), jnp.float32),
        in_specs=[vmem] * 5,
        out_specs=vmem,
        scratch_shapes=[pltpu.VMEM((T * Bp, H), jnp.float32)],
    )(ids_tm, params["x_table"], params["w_hh"], params["w_out"], params["b_out"])

    return out[:B, :C]


def init_params(vocab_size, embedding_dim, sentence_length, hidden=HIDDEN, seed=42):
    k = jax.random.PRNGKey(seed)
    k_emb, k_wih, k_whh, k_bih, k_bhh, k_wo, k_bo = jax.random.split(k, 7)

    emb = jax.random.normal(k_emb, (vocab_size, embedding_dim), jnp.float32) * 0.1
    emb = emb.at[0].set(0.0)  # padding_idx=0 -> zero row

    s = 1.0 / jnp.sqrt(hidden)
    w_ih = jax.random.uniform(k_wih, (embedding_dim, hidden), jnp.float32, -s, s)
    w_hh = jax.random.uniform(k_whh, (hidden, hidden), jnp.float32, -s, s)
    b_ih = jax.random.uniform(k_bih, (1, hidden), jnp.float32, -s, s)
    b_hh = jax.random.uniform(k_bhh, (1, hidden), jnp.float32, -s, s)
    w_out = jax.random.uniform(k_wo, (hidden, sentence_length), jnp.float32, -s, s)
    b_out = jax.random.uniform(k_bo, (1, sentence_length), jnp.float32, -s, s)

    # bf16-round the weights once (shared by kernel and reference).
    emb_bf = emb.astype(jnp.bfloat16)
    w_ih_bf = w_ih.astype(jnp.bfloat16)
    w_hh_bf = w_hh.astype(jnp.bfloat16)
    b = b_ih + b_hh                                              # f32

    # Fold embedding gather + input projection + bias into one (V, H) table.
    x_table = (emb_bf.astype(jnp.float32) @ w_ih_bf.astype(jnp.float32)
               + b).astype(jnp.bfloat16)

    # Pad classifier to 128 lane-dense columns.
    w_out_p = jnp.zeros((hidden, C_PAD), jnp.bfloat16).at[:, :sentence_length].set(
        w_out.astype(jnp.bfloat16))
    b_out_p = jnp.full((1, C_PAD), NEG_BIG, jnp.float32).at[:, :sentence_length].set(b_out)

    return {
        # kernel operands
        "x_table": x_table,            # (V, H) bf16
        "w_hh": w_hh_bf,               # (H, H) bf16
        "w_out": w_out_p,              # (H, 128) bf16, zero-padded
        "b_out": b_out_p,              # (1, 128) f32, -1e30 padding
        "num_classes": sentence_length,
        # raw (bf16-rounded) pieces for the pure-JAX reference
        "embedding": emb_bf,
        "w_ih": w_ih_bf,
        "b": b,                        # f32
    }


def reference_forward(x_ids, params):
    """Pure-JAX reference mirroring the torch module, f32 math throughout."""
    C = params["num_classes"]
    emb = params["embedding"].astype(jnp.float32)
    w_ih = params["w_ih"].astype(jnp.float32)
    w_hh = params["w_hh"].astype(jnp.float32)
    w_out = params["w_out"][:, :C].astype(jnp.float32)
    b_out = params["b_out"][:, :C]
    b = params["b"]

    x_emb = emb[x_ids]                                  # (B, T, D)
    B, T, _ = x_emb.shape
    H = w_hh.shape[0]
    h = jnp.zeros((B, H), jnp.float32)
    for t in range(T):
        h = jnp.tanh(x_emb[:, t, :] @ w_ih + h @ w_hh + b)
    logits = h @ w_out + b_out
    return jax.nn.softmax(logits, axis=1)


if __name__ == "__main__":
    vocab_size = 32
    embedding_dim = 32
    sentence_length = 8
    batch = 2

    params = init_params(vocab_size, embedding_dim, sentence_length)

    key = jax.random.PRNGKey(0)
    x_ids = jax.random.randint(key, (batch, sentence_length), 0, vocab_size,
                               dtype=jnp.int32)

    probs = torch_model_forward(x_ids, params)
    probs = jax.block_until_ready(probs)

    ref = reference_forward(x_ids, params)
    assert probs.shape == (batch, sentence_length)
    # approx reciprocal + bf16 MXU operands -> modest tolerances vs the f32 reference
    assert jnp.allclose(jnp.sum(probs, axis=1), 1.0, atol=1e-2)
    assert jnp.allclose(probs, ref, atol=2e-2)
    assert jnp.array_equal(jnp.argmax(probs, axis=1), jnp.argmax(ref, axis=1))

    # TODO(synk): training-path cross_entropy loss (y is not None) not implemented;
    # only the inference path (softmax output) is kernelized, matching forward(x).
    print("KERNEL_OK")
</pallas_src>

<mosaic_0001>
module attributes {stable_mosaic.version = 11 : i64} {
  func.func @rnn_classifier_kernel(%arg0: memref<64x1xi32, #tpu.memory_space<vmem>>, %arg1: memref<32x128xbf16, #tpu.memory_space<vmem>>, %arg2: memref<128x128xbf16, #tpu.memory_space<vmem>>, %arg3: memref<128x128xbf16, #tpu.memory_space<vmem>>, %arg4: memref<1x128xf32, #tpu.memory_space<vmem>>, %arg5: memref<8x128xf32, #tpu.memory_space<vmem>>, %arg6: memref<64x128xf32, #tpu.memory_space<vmem>>) attributes {dimension_semantics = [], scalar_prefetch = 0 : i64, scratch_operands = 1 : i64, tpu.core_type = #tpu.core_type<tc>} {
    %c0 = arith.constant 0 : index
    %c0_0 = arith.constant 0 : index
    %0 = vector.load %arg0[%c0, %c0_0] : memref<64x1xi32, #tpu.memory_space<vmem>>, vector<64x1xi32>
    %1 = tpu.iota {dimensions = array<i32: 1>} : vector<64x32xi32>
    %2 = vector.broadcast %0 : vector<64x1xi32> to vector<64x32xi32>
    %3 = arith.cmpi eq, %1, %2 : vector<64x32xi32>
    %cst = arith.constant 1.000000e+00 : f32
    %cst_1 = arith.constant 0.000000e+00 : f32
    %4 = vector.broadcast %cst : f32 to vector<64x32xf32>
    %5 = vector.broadcast %cst_1 : f32 to vector<64x32xf32>
    %6 = arith.select %3, %4, %5 : vector<64x32xi1>, vector<64x32xf32>
    %7 = arith.truncf %6 : vector<64x32xf32> to vector<64x32xbf16>
    %c0_2 = arith.constant 0 : index
    %c0_3 = arith.constant 0 : index
    %8 = vector.load %arg1[%c0_2, %c0_3] : memref<32x128xbf16, #tpu.memory_space<vmem>>, vector<32x128xbf16>
    %cst_4 = arith.constant dense<0.000000e+00> : vector<64x128xf32>
    %9 = tpu.matmul %7, %8, %cst_4 {dimension_numbers = #tpu.dot_dimension_numbers<[1], [0], [0], [1], [0, 0, 1, 1], [], []>} : vector<64x32xbf16>, vector<32x128xbf16>, vector<64x128xf32> -> vector<64x128xf32>
    %c0_5 = arith.constant 0 : index
    %c0_6 = arith.constant 0 : index
    %10 = vector.load %arg6[%c0_5, %c0_6] : memref<64x128xf32, #tpu.memory_space<vmem>>, vector<64x128xf32>
    tpu.vector_store %arg6[%c0_5, %c0_6], %9 {strides = array<i32>} : memref<64x128xf32, #tpu.memory_space<vmem>>, vector<64x128xf32>,
    %c0_7 = arith.constant 0 : index
    %c0_8 = arith.constant 0 : index
    %11 = vector.load %arg2[%c0_7, %c0_8] : memref<128x128xbf16, #tpu.memory_space<vmem>>, vector<128x128xbf16>
    %cst_9 = arith.constant 0.000000e+00 : f32
    %12 = vector.broadcast %cst_9 : f32 to vector<8x128xf32>
    %c0_i32 = arith.constant 0 : i32
    %c8_i32 = arith.constant 8 : i32
    %13 = arith.muli %c0_i32, %c8_i32 : i32
    %14 = tpu.assume_multiple %13, 8 : i32
    %15 = arith.index_cast %14 : i32 to index
    %c0_10 = arith.constant 0 : index
    %16 = vector.load %arg6[%15, %c0_10] : memref<64x128xf32, #tpu.memory_space<vmem>>, vector<8x128xf32>
    %17 = arith.truncf %12 : vector<8x128xf32> to vector<8x128xbf16>
    %cst_11 = arith.constant dense<0.000000e+00> : vector<8x128xf32>
    %18 = tpu.matmul %17, %11, %cst_11 {dimension_numbers = #tpu.dot_dimension_numbers<[1], [0], [0], [1], [0, 0, 1, 1], [], []>} : vector<8x128xbf16>, vector<128x128xbf16>, vector<8x128xf32> -> vector<8x128xf32>
    %19 = arith.addf %16, %18 : vector<8x128xf32>
    %20 = math.tanh %19 : vector<8x128xf32>
    %c1_i32 = arith.constant 1 : i32
    %c8_i32_12 = arith.constant 8 : i32
    %21 = arith.muli %c1_i32, %c8_i32_12 : i32
    %22 = tpu.assume_multiple %21, 8 : i32
    %23 = arith.index_cast %22 : i32 to index
    %c0_13 = arith.constant 0 : index
    %24 = vector.load %arg6[%23, %c0_13] : memref<64x128xf32, #tpu.memory_space<vmem>>, vector<8x128xf32>
    %25 = arith.truncf %20 : vector<8x128xf32> to vector<8x128xbf16>
    %cst_14 = arith.constant dense<0.000000e+00> : vector<8x128xf32>
    %26 = tpu.matmul %25, %11, %cst_14 {dimension_numbers = #tpu.dot_dimension_numbers<[1], [0], [0], [1], [0, 0, 1, 1], [], []>} : vector<8x128xbf16>, vector<128x128xbf16>, vector<8x128xf32> -> vector<8x128xf32>
    %27 = arith.addf %24, %26 : vector<8x128xf32>
    %28 = math.tanh %27 : vector<8x128xf32>
    %c2_i32 = arith.constant 2 : i32
    %c8_i32_15 = arith.constant 8 : i32
    %29 = arith.muli %c2_i32, %c8_i32_15 : i32
    %30 = tpu.assume_multiple %29, 8 : i32
    %31 = arith.index_cast %30 : i32 to index
    %c0_16 = arith.constant 0 : index
    %32 = vector.load %arg6[%31, %c0_16] : memref<64x128xf32, #tpu.memory_space<vmem>>, vector<8x128xf32>
    %33 = arith.truncf %28 : vector<8x128xf32> to vector<8x128xbf16>
    %cst_17 = arith.constant dense<0.000000e+00> : vector<8x128xf32>
    %34 = tpu.matmul %33, %11, %cst_17 {dimension_numbers = #tpu.dot_dimension_numbers<[1], [0], [0], [1], [0, 0, 1, 1], [], []>} : vector<8x128xbf16>, vector<128x128xbf16>, vector<8x128xf32> -> vector<8x128xf32>
    %35 = arith.addf %32, %34 : vector<8x128xf32>
    %36 = math.tanh %35 : vector<8x128xf32>
    %c3_i32 = arith.constant 3 : i32
    %c8_i32_18 = arith.constant 8 : i32
    %37 = arith.muli %c3_i32, %c8_i32_18 : i32
    %38 = tpu.assume_multiple %37, 8 : i32
    %39 = arith.index_cast %38 : i32 to index
    %c0_19 = arith.constant 0 : index
    %40 = vector.load %arg6[%39, %c0_19] : memref<64x128xf32, #tpu.memory_space<vmem>>, vector<8x128xf32>
    %41 = arith.truncf %36 : vector<8x128xf32> to vector<8x128xbf16>
    %cst_20 = arith.constant dense<0.000000e+00> : vector<8x128xf32>
    %42 = tpu.matmul %41, %11, %cst_20 {dimension_numbers = #tpu.dot_dimension_numbers<[1], [0], [0], [1], [0, 0, 1, 1], [], []>} : vector<8x128xbf16>, vector<128x128xbf16>, vector<8x128xf32> -> vector<8x128xf32>
    %43 = arith.addf %40, %42 : vector<8x128xf32>
    %44 = math.tanh %43 : vector<8x128xf32>
    %c4_i32 = arith.constant 4 : i32
    %c8_i32_21 = arith.constant 8 : i32
    %45 = arith.muli %c4_i32, %c8_i32_21 : i32
    %46 = tpu.assume_multiple %45, 8 : i32
    %47 = arith.index_cast %46 : i32 to index
    %c0_22 = arith.constant 0 : index
    %48 = vector.load %arg6[%47, %c0_22] : memref<64x128xf32, #tpu.memory_space<vmem>>, vector<8x128xf32>
    %49 = arith.truncf %44 : vector<8x128xf32> to vector<8x128xbf16>
    %cst_23 = arith.constant dense<0.000000e+00> : vector<8x128xf32>
    %50 = tpu.matmul %49, %11, %cst_23 {dimension_numbers = #tpu.dot_dimension_numbers<[1], [0], [0], [1], [0, 0, 1, 1], [], []>} : vector<8x128xbf16>, vector<128x128xbf16>, vector<8x128xf32> -> vector<8x128xf32>
    %51 = arith.addf %48, %50 : vector<8x128xf32>
    %52 = math.tanh %51 : vector<8x128xf32>
    %c5_i32 = arith.constant 5 : i32
    %c8_i32_24 = arith.constant 8 : i32
    %53 = arith.muli %c5_i32, %c8_i32_24 : i32
    %54 = tpu.assume_multiple %53, 8 : i32
    %55 = arith.index_cast %54 : i32 to index
    %c0_25 = arith.constant 0 : index
    %56 = vector.load %arg6[%55, %c0_25] : memref<64x128xf32, #tpu.memory_space<vmem>>, vector<8x128xf32>
    %57 = arith.truncf %52 : vector<8x128xf32> to vector<8x128xbf16>
    %cst_26 = arith.constant dense<0.000000e+00> : vector<8x128xf32>
    %58 = tpu.matmul %57, %11, %cst_26 {dimension_numbers = #tpu.dot_dimension_numbers<[1], [0], [0], [1], [0, 0, 1, 1], [], []>} : vector<8x128xbf16>, vector<128x128xbf16>, vector<8x128xf32> -> vector<8x128xf32>
    %59 = arith.addf %56, %58 : vector<8x128xf32>
    %60 = math.tanh %59 : vector<8x128xf32>
    %c6_i32 = arith.constant 6 : i32
    %c8_i32_27 = arith.constant 8 : i32
    %61 = arith.muli %c6_i32, %c8_i32_27 : i32
    %62 = tpu.assume_multiple %61, 8 : i32
    %63 = arith.index_cast %62 : i32 to index
    %c0_28 = arith.constant 0 : index
    %64 = vector.load %arg6[%63, %c0_28] : memref<64x128xf32, #tpu.memory_space<vmem>>, vector<8x128xf32>
    %65 = arith.truncf %60 : vector<8x128xf32> to vector<8x128xbf16>
    %cst_29 = arith.constant dense<0.000000e+00> : vector<8x128xf32>
    %66 = tpu.matmul %65, %11, %cst_29 {dimension_numbers = #tpu.dot_dimension_numbers<[1], [0], [0], [1], [0, 0, 1, 1], [], []>} : vector<8x128xbf16>, vector<128x128xbf16>, vector<8x128xf32> -> vector<8x128xf32>
    %67 = arith.addf %64, %66 : vector<8x128xf32>
    %68 = math.tanh %67 : vector<8x128xf32>
    %c7_i32 = arith.constant 7 : i32
    %c8_i32_30 = arith.constant 8 : i32
    %69 = arith.muli %c7_i32, %c8_i32_30 : i32
    %70 = tpu.assume_multiple %69, 8 : i32
    %71 = arith.index_cast %70 : i32 to index
    %c0_31 = arith.constant 0 : index
    %72 = vector.load %arg6[%71, %c0_31] : memref<64x128xf32, #tpu.memory_space<vmem>>, vector<8x128xf32>
    %73 = arith.truncf %68 : vector<8x128xf32> to vector<8x128xbf16>
    %cst_32 = arith.constant dense<0.000000e+00> : vector<8x128xf32>
    %74 = tpu.matmul %73, %11, %cst_32 {dimension_numbers = #tpu.dot_dimension_numbers<[1], [0], [0], [1], [0, 0, 1, 1], [], []>} : vector<8x128xbf16>, vector<128x128xbf16>, vector<8x128xf32> -> vector<8x128xf32>
    %75 = arith.addf %72, %74 : vector<8x128xf32>
    %76 = math.tanh %75 : vector<8x128xf32>
    %c8_i32_33 = arith.constant 8 : i32
    %77 = arith.truncf %76 : vector<8x128xf32> to vector<8x128xbf16>
    %c0_34 = arith.constant 0 : index
    %c0_35 = arith.constant 0 : index
    %78 = vector.load %arg3[%c0_34, %c0_35] : memref<128x128xbf16, #tpu.memory_space<vmem>>, vector<128x128xbf16>
    %cst_36 = arith.constant dense<0.000000e+00> : vector<8x128xf32>
    %79 = tpu.matmul %77, %78, %cst_36 {dimension_numbers = #tpu.dot_dimension_numbers<[1], [0], [0], [1], [0, 0, 1, 1], [], []>} : vector<8x128xbf16>, vector<128x128xbf16>, vector<8x128xf32> -> vector<8x128xf32>
    %c0_37 = arith.constant 0 : index
    %c0_38 = arith.constant 0 : index
    %80 = vector.load %arg4[%c0_37, %c0_38] : memref<1x128xf32, #tpu.memory_space<vmem>>, vector<1x128xf32>
    %81 = vector.broadcast %80 : vector<1x128xf32> to vector<8x128xf32>
    %82 = arith.addf %79, %81 : vector<8x128xf32>
    %cst_39 = arith.constant dense<0xFF800000> : vector<8xf32>
    %83 = vector.multi_reduction <maximumf>, %82, %cst_39 [1] : vector<8x128xf32> to vector<8xf32>
    %84 = vector.shape_cast %83 : vector<8xf32> to vector<8x1xf32>
    %85 = vector.broadcast %84 : vector<8x1xf32> to vector<8x128xf32>
    %86 = arith.subf %82, %85 : vector<8x128xf32>
    %87 = math.exp %86 : vector<8x128xf32>
    %cst_40 = arith.constant dense<0.000000e+00> : vector<8xf32>
    %88 = vector.multi_reduction <add>, %87, %cst_40 [1] : vector<8x128xf32> to vector<8xf32>
    %89 = vector.shape_cast %88 : vector<8xf32> to vector<8x1xf32>
    %90 = tpu.reciprocal %89 {approx = true} : vector<8x1xf32> -> vector<8x1xf32>
    %91 = vector.broadcast %90 : vector<8x1xf32> to vector<8x128xf32>
    %92 = arith.mulf %87, %91 : vector<8x128xf32>
    %c0_41 = arith.constant 0 : index
    %c0_42 = arith.constant 0 : index
    %93 = vector.load %arg5[%c0_41, %c0_42] : memref<8x128xf32, #tpu.memory_space<vmem>>, vector<8x128xf32>
    tpu.vector_store %arg5[%c0_41, %c0_42], %92 {strides = array<i32>} : memref<8x128xf32, #tpu.memory_space<vmem>>, vector<8x128xf32>,
    return
  }
}

</mosaic_0001>

<bundles_post_ra>
// kernel: tpu_custom_call.1
= control target key start
LH: loop header
LB: loop body
LE: loop exit
PB: predicated region body
PF: predicated region fallthrough
CT: control target
= control target key end

     0   :  { %10 = vsyncpa [#allocation4], 0  ;;  %s874_s0 = inlined_call_operand.vmem [shape: s32[64,1], index: 0, kind: input, shape index: {}]   ;;  %s875_s1 = inlined_call_operand.hbm [shape: bf16[32,128], index: 1, kind: input, shape index: {}]   ;;  %s876_s2 = inlined_call_operand.vmem [shape: bf16[128,128], index: 2, kind: input, shape index: {}]   ;;  %s877_s3 = inlined_call_operand.hbm [shape: bf16[128,128], index: 3, kind: input, shape index: {}]   ;;  %s878_s4 = inlined_call_operand.vmem [shape: f32[1,128], index: 4, kind: input, shape index: {}]   ;;  %s879_s5 = inlined_call_operand.hbm [shape: f32[8,128], index: 5, kind: output, shape index: {}]  }
   0x1   :  { %11 = vsyncpa [#allocation7], 0 }
   0x2   :  { %12 = vsyncpa [#allocation5], 0  ;;  %s19_s20 = sshll.u32 %s875_s1, 4  ;;  %s693_s21 = smov [#allocation3]   ;;  %s20_s20 = int_to_ptr.hbm [resolvable:$true] %s19_s20 }
   0x3   :  { %s21_s22 = sshll.u32 %s693_s21, 4  ;;  %s34_s25 = sshll.u32 %s877_s3, 4  ;;  %s22_s22 = int_to_ptr.vmem [resolvable:$true] %s21_s22  ;;  %s35_s25 = int_to_ptr.hbm [resolvable:$true] %s34_s25 }
   0x4   :  { %s694_s26 = smov 64   ;;  %s695_s27 = smov 4  }
   0x5   :  { %27 = dma.hbm_to_vmem [thread:$0]  %s20_s20, 256, %s22_s22, [#allocation4], %s694_s26, %s694_s26, %s695_s27  }
   0x6   :  { %s696_s28 = smov [#allocation6]  }
   0x7   :  { %s36_s29 = sshll.u32 %s696_s28, 4  ;;  %s37_s29 = int_to_ptr.vmem [resolvable:$true] %s36_s29 }
   0x8   :  { %42 = dma.hbm_to_vmem [thread:$0]  %s35_s25, 1024, %s37_s29, [#allocation7], %s694_s26, %s694_s26, %s695_s27  }
   0x9   :  { %687 = dma.done.wait [#allocation4], 256  }
   0xa   :  { %688 = vsyncadd [#allocation4], 4294967040 }
   0xb   :  { %689 = dma.done.wait [#allocation7], 1024  }
   0xc   :  { %690 = vsyncadd [#allocation7], 4294966272  ;;  %v697_v0 = vmov 0   ;;  %v56_v1 = vld [vmem:[%s874_s0 + $0x10] sm:$0xff]  ;;  %v54_v2 = vld [vmem:[%s874_s0] sm:$0xff]  ;;  %v62_v19 = vlaneseq  ;;  %v698_v24 = vmov 0.0  }
   0xd   :  { %592 = vset.pattern.permute.xlu1 %v697_v0  ;;  %591 = vset.pattern.permute.xlu0 %v697_v0  ;;  %v58_v3 = vld [vmem:[%s874_s0 + $0x20] sm:$0xff]  ;;  %v748_v4 = vld [vmem:[%s876_s2 + $0x38] sm:$0xff]  ;;  %v754_v5 = vld [vmem:[%s876_s2 + $0x30] sm:$0xff]  ;;  %vm124_vm2 = vcmask 261120   ;;  %s699_s8 = smov [#allocation8]   ;;  %s479_s12 = sshll.u32 %s879_s5, 4  ;;  %s480_s12 = int_to_ptr.hbm [resolvable:$true] %s479_s12 }
   0xe   :  { %593 = vset.pattern.permute.xlu2 %v697_v0  ;;  %71 = vperm.xlu1 %592, %v56_v1   ;;  %v57_v6 = vld [vmem:[%s874_s0 + $0x18] sm:$0xff]  ;;  %v55_v7 = vld [vmem:[%s874_s0 + $0x8] sm:$0xff]  ;;  %v779_v10 = vld [vmem:[%s876_s2 + $0x20] sm:$0xff]  ;;  %v63_v21 = vand.u32 127, %v62_v19  ;;  %s477_s9 = sshll.u32 %s699_s8, 4  ;;  %s478_s9 = int_to_ptr.vmem [resolvable:$true] %s477_s9 }
   0xf   :  { %65 = vperm.xlu0 %591, %v54_v2   ;;  %77 = vperm.xlu2 %593, %v58_v3   ;;  %v59_v8 = vld [vmem:[%s874_s0 + $0x28] sm:$0xff]  ;;  %v61_v11 = vld [vmem:[%s874_s0 + $0x38] sm:$0xff]  ;;  %v60_v12 = vld [vmem:[%s874_s0 + $0x30] sm:$0xff] }
  0x10   :  { %239 = vmatpush.bf16.msra.mxu1 %v748_v4  ;;  %257 = vmatpush.bf16.msra.mxu2 %v748_v4  ;;  %v771_v9 = vld [vmem:[%s876_s2 + $0x28] sm:$0xff]  ;;  %v793_v13 = vld [vmem:[%s876_s2 + $0x18] sm:$0xff]  ;;  %v801_v14 = vld [vmem:[%s876_s2 + $0x10] sm:$0xff] }
  0x11   :  { %275 = vmatpush.bf16.msra.mxu3 %v748_v4  ;;  %v809_v15 = vld [vmem:[%s876_s2 + $0x8] sm:$0xff]  ;;  %v819_v16 = vld [vmem:[%s876_s2] sm:$0xff] }
  0x12   :  { %v567_v17 = vld [vmem:[#allocation3 + $0x8] sm:$0xff]  ;;  %v566_v18 = vld [vmem:[#allocation3] sm:$0xff] }
  0x13   :  { %143 = vmatpush.bf16.msra.mxu0 %v567_v17  ;;  %v581_v17 = vld [vmem:[#allocation6 + $0x28] sm:$0xff] }
  0x14   :  { %240 = vmatpush.bf16.msra.mxu1 %v754_v5  ;;  %258 = vmatpush.bf16.msra.mxu2 %v754_v5 }
  0x15   :  { %276 = vmatpush.bf16.msra.mxu3 %v754_v5 }
  0x16   :  { %74 = vperm.xlu1 %592, %v57_v6  }
  0x17   :  { %68 = vperm.xlu0 %591, %v55_v7   ;;  %80 = vperm.xlu2 %593, %v59_v8  }
  0x18   :  { %241 = vmatpush.bf16.msra.mxu1 %v771_v9  ;;  %259 = vmatpush.bf16.msra.mxu2 %v771_v9 }
  0x19   :  { %277 = vmatpush.bf16.msra.mxu3 %v771_v9  ;;  %144 = vmatpush.bf16.msra.mxu0 %v566_v18  ;;  %v580_v18 = vld [vmem:[#allocation6 + $0x20] sm:$0xff] }
  0x1c   :  { %242 = vmatpush.bf16.msra.mxu1 %v779_v10  ;;  %260 = vmatpush.bf16.msra.mxu2 %v779_v10 }
  0x1d   :  { %278 = vmatpush.bf16.msra.mxu3 %v779_v10  ;;  %347 = vmatpush.bf16.msrb.mxu0 %v748_v4 }
  0x1e   :  { %86 = vperm.xlu1 %592, %v61_v11  }
  0x1f   :  { %83 = vperm.xlu0 %591, %v60_v12  }
  0x20   :  { %243 = vmatpush.bf16.msra.mxu1 %v793_v13  ;;  %261 = vmatpush.bf16.msra.mxu2 %v793_v13 }
  0x21   :  { %279 = vmatpush.bf16.msra.mxu3 %v793_v13  ;;  %348 = vmatpush.bf16.msrb.mxu0 %v754_v5 }
  0x24   :  { %244 = vmatpush.bf16.msra.mxu1 %v801_v14  ;;  %262 = vmatpush.bf16.msra.mxu2 %v801_v14 }
  0x25   :  { %280 = vmatpush.bf16.msra.mxu3 %v801_v14  ;;  %349 = vmatpush.bf16.msrb.mxu0 %v771_v9 }
  0x28   :  { %245 = vmatpush.bf16.msra.mxu1 %v809_v15  ;;  %263 = vmatpush.bf16.msra.mxu2 %v809_v15 }
  0x29   :  { %281 = vmatpush.bf16.msra.mxu3 %v809_v15  ;;  %350 = vmatpush.bf16.msrb.mxu0 %v779_v10 }
  0x2c   :  { %246 = vmatpush.bf16.msra.mxu1 %v819_v16  ;;  %264 = vmatpush.bf16.msra.mxu2 %v819_v16 }
  0x2d   :  { %282 = vmatpush.bf16.msra.mxu3 %v819_v16  ;;  %351 = vmatpush.bf16.msrb.mxu0 %v793_v13 }
  0x2f   :  { %247 = vmatmul.bf16.vlgmr.msra.gmra.mxu1 %v697_v0 }
  0x30   :  { %293 = vmatpush.bf16.msrb.mxu1 %v748_v4  ;;  %311 = vmatpush.bf16.msrb.mxu2 %v748_v4 }
  0x31   :  { %329 = vmatpush.bf16.msrb.mxu3 %v748_v4  ;;  %352 = vmatpush.bf16.msrb.mxu0 %v801_v14 }
  0x34   :  { %294 = vmatpush.bf16.msrb.mxu1 %v754_v5  ;;  %312 = vmatpush.bf16.msrb.mxu2 %v754_v5 }
  0x35   :  { %330 = vmatpush.bf16.msrb.mxu3 %v754_v5  ;;  %353 = vmatpush.bf16.msrb.mxu0 %v809_v15 }
  0x38   :  { %295 = vmatpush.bf16.msrb.mxu1 %v771_v9  ;;  %313 = vmatpush.bf16.msrb.mxu2 %v771_v9 }
  0x39   :  { %331 = vmatpush.bf16.msrb.mxu3 %v771_v9  ;;  %354 = vmatpush.bf16.msrb.mxu0 %v819_v16 }
  0x3c   :  { %296 = vmatpush.bf16.msrb.mxu1 %v779_v10  ;;  %314 = vmatpush.bf16.msrb.mxu2 %v779_v10 }
  0x3d   :  { %332 = vmatpush.bf16.msrb.mxu3 %v779_v10 }
  0x40   :  { %297 = vmatpush.bf16.msrb.mxu1 %v793_v13  ;;  %315 = vmatpush.bf16.msrb.mxu2 %v793_v13 }
  0x41   :  { %333 = vmatpush.bf16.msrb.mxu3 %v793_v13 }
  0x44   :  { %298 = vmatpush.bf16.msrb.mxu1 %v801_v14  ;;  %316 = vmatpush.bf16.msrb.mxu2 %v801_v14 }
  0x45   :  { %334 = vmatpush.bf16.msrb.mxu3 %v801_v14 }
  0x48   :  { %299 = vmatpush.bf16.msrb.mxu1 %v809_v15  ;;  %317 = vmatpush.bf16.msrb.mxu2 %v809_v15 }
  0x49   :  { %335 = vmatpush.bf16.msrb.mxu3 %v809_v15 }
  0x4c   :  { %300 = vmatpush.bf16.msrb.mxu1 %v819_v16  ;;  %318 = vmatpush.bf16.msrb.mxu2 %v819_v16 }
  0x4d   :  { %336 = vmatpush.bf16.msrb.mxu3 %v819_v16 }
  0x50   :  { %365 = vmatpush.bf16.msra.mxu1 %v748_v4 }
  0x54   :  { %366 = vmatpush.bf16.msra.mxu1 %v754_v5 }
  0x58   :  { %367 = vmatpush.bf16.msra.mxu1 %v771_v9 }
  0x5c   :  { %368 = vmatpush.bf16.msra.mxu1 %v779_v10 }
  0x60   :  { %369 = vmatpush.bf16.msra.mxu1 %v793_v13 }
  0x64   :  { %370 = vmatpush.bf16.msra.mxu1 %v801_v14  ;;  %v583_v14 = vld [vmem:[#allocation6 + $0x38] sm:$0xff] }
  0x68   :  { %371 = vmatpush.bf16.msra.mxu1 %v809_v15 }
  0x69   :  { %v78_v31 = vpop.permute.xlu2 %77 }
  0x6a   :  { %vm92_vm5 = vcmp.eq.s32.totalorder %v63_v21, %v78_v31 }
  0x6b   :  { %v100_v34 = vsel %vm92_vm5, 1.0, %v698_v24 }
  0x6c   :  { %372 = vmatpush.bf16.msra.mxu1 %v819_v16  ;;  %v582_v16 = vld [vmem:[#allocation6 + $0x30] sm:$0xff] }
  0x71   :  { %v81_v33 = vpop.permute.xlu2 %80 }
  0x72   :  { %vm93_vm6 = vcmp.eq.s32.totalorder %v63_v21, %v81_v33 }
  0x73   :  { %v101_v35 = vsel %vm93_vm6, 1.0, %v698_v24 }
  0x74   :  { %v106_v36 = vpack.c.bf16 %v101_v35, %v100_v34  ;;  %v594_v34 = vld [vmem:[%s878_s4] ss:$0 sm:$0xff] }
  0x80   :  { %v72_v22 = vpop.permute.xlu1 %71 }
  0x81   :  { %v66_v20 = vpop.permute.xlu0 %65  ;;  %vm90_vm3 = vcmp.eq.s32.totalorder %v63_v21, %v72_v22 }
  0x82   :  { %vm88_vm0 = vcmp.eq.s32.totalorder %v63_v21, %v66_v20  ;;  %v98_v29 = vsel %vm90_vm3, 1.0, %v698_v24  ;;  %v579_v20 = vld [vmem:[#allocation6 + $0x18] sm:$0xff] }
  0x83   :  { %v96_v25 = vsel %vm88_vm0, 1.0, %v698_v24 }
  0x88   :  { %v75_v28 = vpop.permute.xlu1 %74 }
  0x89   :  { %v69_v23 = vpop.permute.xlu0 %68  ;;  %vm91_vm4 = vcmp.eq.s32.totalorder %v63_v21, %v75_v28  ;;  %v576_v28 = vld [vmem:[#allocation6] sm:$0xff] }
  0x8a   :  { %vm89_vm1 = vcmp.eq.s32.totalorder %v63_v21, %v69_v23  ;;  %v99_v30 = vsel %vm91_vm4, 1.0, %v698_v24 }
  0x8b   :  { %v97_v26 = vsel %vm89_vm1, 1.0, %v698_v24  ;;  %v105_v32 = vpack.c.bf16 %v99_v30, %v98_v29 }
  0x8c   :  { %v104_v27 = vpack.c.bf16 %v97_v26, %v96_v25  ;;  %v578_v26 = vld [vmem:[#allocation6 + $0x10] sm:$0xff] }
  0x8e   :  { %498 = vmatmul.msk.bf16.vlgmr.msra.gmra.mxu0 %vm124_vm2, %v104_v27  ;;  %v577_v27 = vld [vmem:[#allocation6 + $0x8] sm:$0xff] }
  0x90   :  { %v87_v37 = vpop.permute.xlu1 %86 }
  0x91   :  { %v84_v38 = vpop.permute.xlu0 %83  ;;  %vm95_vm7 = vcmp.eq.s32.totalorder %v63_v21, %v87_v37 }
  0x92   :  { %vm94_vm8 = vcmp.eq.s32.totalorder %v63_v21, %v84_v38  ;;  %v103_v39 = vsel %vm95_vm7, 1.0, %v698_v24 }
  0x93   :  { %v102_v40 = vsel %vm94_vm8, 1.0, %v698_v24 }
  0x94   :  { %v107_v41 = vpack.c.bf16 %v103_v39, %v102_v40 }
  0x9e   :  { %499 = vmatmul.msk.bf16.gmra.mxu0 %vm124_vm2, %v105_v32 }
  0xac   :  { %v248_v42 = vpop.f32.mrf.mxu1 }
  0xae   :  { %500 = vmatmul.msk.bf16.gmra.mxu0 %vm124_vm2, %v106_v36 }
  0xb4   :  { %v250_v43 = vpop.f32.mrf.mxu1 }
  0xbe   :  { %501 = vmatmul.msk.bf16.gmra.mxu0 %vm124_vm2, %v107_v41 }
 0x10b   :  { %v146_v44 = vpop.f32.mrf.mxu0 }
 0x10c   :  { %v252_v45 = vadd.f32 %v248_v42, %v146_v44 }
 0x10e   :  { %595 = vtanh.f32 %v252_v45 }
 0x113   :  { %v148_v48 = vpop.f32.mrf.mxu0 }
 0x114   :  { %v596_v46 = vpop.eup %595 }
 0x115   :  { %v256_v47 = vpack.c.bf16 %v596_v46, %v596_v46 }
 0x117   :  { %265 = vmatmul.bf16.vlgmr.msra.gmra.mxu2 %v256_v47 }
 0x118   :  { %449 = vmatpush.bf16.msra.mxu2 %v583_v14 }
 0x11b   :  { %v151_v54 = vpop.f32.mrf.mxu0 }
 0x11c   :  { %450 = vmatpush.bf16.msra.mxu2 %v582_v16 }
 0x120   :  { %451 = vmatpush.bf16.msra.mxu2 %v581_v17 }
 0x123   :  { %v153_v60 = vpop.f32.mrf.mxu0 }
 0x124   :  { %452 = vmatpush.bf16.msra.mxu2 %v580_v18 }
 0x128   :  { %453 = vmatpush.bf16.msra.mxu2 %v579_v20 }
 0x12b   :  { %v156_v2 = vpop.f32.mrf.mxu0 }
 0x12c   :  { %454 = vmatpush.bf16.msra.mxu2 %v578_v26 }
 0x130   :  { %455 = vmatpush.bf16.msra.mxu2 %v577_v27 }
 0x133   :  { %v158_v8 = vpop.f32.mrf.mxu0 }
 0x134   :  { %456 = vmatpush.bf16.msra.mxu2 %v576_v28 }
 0x13b   :  { %v161_v15 = vpop.f32.mrf.mxu0 }
 0x143   :  { %v163_v19 = vpop.f32.mrf.mxu0 }
 0x19a   :  { %v266_v49 = vpop.f32.mrf.mxu2 }
 0x19b   :  { %v270_v50 = vadd.f32 %v266_v49, %v148_v48 }
 0x19d   :  { %597 = vtanh.f32 %v270_v50 }
 0x1a2   :  { %v268_v51 = vpop.f32.mrf.mxu2 }
 0x1a3   :  { %v598_v52 = vpop.eup %597 }
 0x1a4   :  { %v274_v53 = vpack.c.bf16 %v598_v52, %v598_v52 }
 0x1a6   :  { %283 = vmatmul.bf16.vlgmr.msra.gmra.mxu3 %v274_v53 }
 0x229   :  { %v284_v55 = vpop.f32.mrf.mxu3 }
 0x22a   :  { %v288_v56 = vadd.f32 %v284_v55, %v151_v54 }
 0x22c   :  { %599 = vtanh.f32 %v288_v56 }
 0x231   :  { %v286_v57 = vpop.f32.mrf.mxu3 }
 0x232   :  { %v600_v58 = vpop.eup %599 }
 0x233   :  { %v292_v59 = vpack.c.bf16 %v600_v58, %v600_v58 }
 0x235   :  { %301 = vmatmul.bf16.vlgmr.msrb.gmra.mxu1 %v292_v59 }
 0x2b2   :  { %v302_v61 = vpop.f32.mrf.mxu1 }
 0x2b3   :  { %v306_v62 = vadd.f32 %v302_v61, %v153_v60 }
 0x2b5   :  { %601 = vtanh.f32 %v306_v62 }
 0x2ba   :  { %v304_v63 = vpop.f32.mrf.mxu1 }
 0x2bb   :  { %v602_v0 = vpop.eup %601 }
 0x2bc   :  { %v310_v1 = vpack.c.bf16 %v602_v0, %v602_v0 }
 0x2be   :  { %319 = vmatmul.bf16.vlgmr.msrb.gmra.mxu2 %v310_v1 }
 0x341   :  { %v320_v3 = vpop.f32.mrf.mxu2 }
 0x342   :  { %v324_v4 = vadd.f32 %v320_v3, %v156_v2 }
 0x344   :  { %603 = vtanh.f32 %v324_v4 }
 0x349   :  { %v322_v5 = vpop.f32.mrf.mxu2 }
 0x34a   :  { %v604_v6 = vpop.eup %603 }
 0x34b   :  { %v328_v7 = vpack.c.bf16 %v604_v6, %v604_v6 }
 0x34d   :  { %337 = vmatmul.bf16.vlgmr.msrb.gmra.mxu3 %v328_v7 }
 0x3d0   :  { %v338_v9 = vpop.f32.mrf.mxu3 }
 0x3d1   :  { %v342_v10 = vadd.f32 %v338_v9, %v158_v8 }
 0x3d3   :  { %605 = vtanh.f32 %v342_v10 }
 0x3d8   :  { %v340_v11 = vpop.f32.mrf.mxu3 }
 0x3d9   :  { %v606_v12 = vpop.eup %605 }
 0x3da   :  { %v346_v13 = vpack.c.bf16 %v606_v12, %v606_v12 }
 0x3dc   :  { %355 = vmatmul.bf16.vlgmr.msrb.gmra.mxu0 %v346_v13 }
 0x459   :  { %v356_v21 = vpop.f32.mrf.mxu0 }
 0x45a   :  { %v360_v22 = vadd.f32 %v356_v21, %v161_v15 }
 0x45c   :  { %607 = vtanh.f32 %v360_v22 }
 0x461   :  { %v358_v23 = vpop.f32.mrf.mxu0 }
 0x462   :  { %v608_v24 = vpop.eup %607 }
 0x463   :  { %v364_v25 = vpack.c.bf16 %v608_v24, %v608_v24 }
 0x465   :  { %373 = vmatmul.bf16.vlgmr.msra.gmra.mxu1 %v364_v25 }
 0x4e2   :  { %v374_v29 = vpop.f32.mrf.mxu1 }
 0x4e3   :  { %v378_v30 = vadd.f32 %v374_v29, %v163_v19 }
 0x4e5   :  { %609 = vtanh.f32 %v378_v30 }
 0x4ea   :  { %v376_v31 = vpop.f32.mrf.mxu1 }
 0x4eb   :  { %v610_v32 = vpop.eup %609 }
 0x4ec   :  { %v380_v33 = vpack.c.bf16 %v610_v32, %v610_v32 }
 0x4ee   :  { %457 = vmatmul.bf16.vlgmr.msra.gmra.mxu2 %v380_v33 }
 0x571   :  { %v458_v35 = vpop.f32.mrf.mxu2 }
 0x572   :  { %v459_v36 = vadd.f32 %v594_v34, %v458_v35 }
 0x574   :  { %462 = vmax.xlane.f32.xlu2 %v459_v36 }
 0x579   :  { %v460_v37 = vpop.f32.mrf.mxu2 }
 0x5e7   :  { %v463_v38 = vpop.xlane.xlu2 %462 }
 0x5e8   :  { %v464_v39 = vsub.f32 %v459_v36, %v463_v38 }
 0x5ea   :  { %v465_v40 = vmul.f32 1.442695, %v464_v39 }
 0x5ec   :  { %611 = vpow2.f32 %v465_v40 }
 0x5f2   :  { %v612_v41 = vpop.eup %611 }
 0x5f3   :  { %467 = vadd.xlane.f32.xlu0 %v612_v41 }
 0x666   :  { %v468_v42 = vpop.xlane.xlu0 %467 }
 0x667   :  { %613 = vrcp.f32 %v468_v42 }
 0x66d   :  { %v614_v43 = vpop.eup %613 }
 0x66e   :  { %v470_v44 = vmul.f32 %v614_v43, %v612_v41 }
 0x670   :  { %471 = vst [vmem:[#allocation8] sm:$0xff] %v470_v44 }
 0x671   :  { %482 = dma.vmem_to_hbm [thread:$0]  %s478_s9, 128, %s480_s12, [#allocation5]  }
 0x672   :  { %691 = dma.done.wait [#allocation5], 128  }
 0x673   :  { %692 = vsyncadd [#allocation5], 4294967168 }
 0x674   :  { %487 = vsyncpa [#allocation4], 1 }
 0x675   :  { %488 = vsyncpa [#allocation7], 1 }
 0x676   :  { %489 = vsyncpa [#allocation5], 1 }

</bundles_post_ra>
